<compile_context>
chip_gen: v6e
topology: v6e:2x2x1
jax: 0.10.0
libtpu: 0.0.40
codegen_flags: <defaults>
</compile_context>

<pallas_src>
import functools

import jax
import jax.numpy as jnp
from jax.experimental import pallas as pl
from jax.experimental.pallas import tpu as pltpu


def _round_up(x, m):
    return ((x + m - 1) // m) * m


def _cdiv(a, b):
    return (a + b - 1) // b


def _tpu_params():
    """Generation-aware (target token tile, physical VMEM bytes per core)."""
    vmem_cap = 64 * 2**20  # conservative default (v7x per-TC VMEM)
    try:
        vmem_cap = int(pltpu.get_tpu_info().vmem_capacity_bytes)
    except Exception:
        pass
    kind = ""
    try:
        kind = jax.devices()[0].device_kind.lower()
    except Exception:
        pass
    # Roofline crossover (FLOPs per weight byte): ~240 v5e, ~680 v6e, ~311 v7x.
    if "v5" in kind:
        target_tm = 256
    elif "v6" in kind:
        target_tm = 512
    elif "7" in kind:
        target_tm = 512  # VMEM-fit logic below shrinks this if 64 MiB is tight
    else:
        target_tm = 512 if vmem_cap > 64 * 2**20 else 256
    return target_tm, vmem_cap


def _vmem_footprint(tm, ti, H, w_itemsize, x_itemsize, resident):
    """Rough live-VMEM estimate for one kernel instance (bytes)."""
    w_bufs = 1 if resident else 2  # constant index_map => single resident buffer
    return (2 * tm * H * x_itemsize                      # x tile (double-buffered)
            + 2 * tm * H * x_itemsize                    # out tile (double-buffered)
            + tm * H * 4                                 # f32 accumulator scratch
            + w_bufs * 3 * H * ti * w_itemsize           # fused W1 (H,2ti) + W2 (ti,H)
            + w_bufs * 2 * ti * w_itemsize               # fused bias block
            + 2 * H * x_itemsize                         # b2 (tiny)
            + 3 * tm * 2 * ti * 4                        # f32 swiglu temps / spill slack
            + (1 << 20))                                 # Mosaic internal scratch headroom


def _plan_intermediate(H, I, itemsize, target_tm, vmem_budget, max_ti=None):
    """Pick (padded I, ti).  ti == Ip means the weights stay VMEM-resident."""
    Ip_res = _round_up(I, 128)
    if max_ti is None and _vmem_footprint(target_tm, Ip_res, H, itemsize,
                                          itemsize, True) <= vmem_budget:
        return Ip_res, Ip_res
    # Stream I: pad so nice lane-aligned tiles divide it (never the old
    # "whole-I fallback" that could double-buffer full weight matrices).
    Ip = _round_up(I, 512) if I > 512 else _round_up(I, 128)
    for ti in (Ip, 512, 256, 128):
        if max_ti is not None and ti > max_ti:
            continue
        if Ip % ti == 0 and _vmem_footprint(target_tm, ti, H, itemsize,
                                            itemsize, ti == Ip) <= vmem_budget:
            return Ip, ti
    return Ip, 128


def prepare_swiglu_weights(w1, b1, w2, b2, *, weight_dtype=None, max_ti=None):
    """One-time weight prep (PyTorch Linear layout -> kernel layout).

    w1: (2I, H), b1: (2I,), w2: (H, I), b2: (H,).  Call ONCE at weight-load
    time.  Pass weight_dtype=jnp.bfloat16 to halve weight HBM bytes (notably
    useful on bandwidth-bound v5e); default keeps the input dtype.
    """
    two_I, H = w1.shape
    I = two_I // 2
    if weight_dtype is not None:
        w1 = w1.astype(weight_dtype)
        b1 = b1.astype(weight_dtype)
        w2 = w2.astype(weight_dtype)
        b2 = b2.astype(weight_dtype)

    target_tm, vmem_cap = _tpu_params()
    itemsize = jnp.dtype(w1.dtype).itemsize
    Ip, ti = _plan_intermediate(H, I, itemsize, target_tm,
                                int(0.80 * vmem_cap), max_ti=max_ti)
    pad_I = Ip - I

    wg = jnp.transpose(w1[0::2, :])          # (H, I) gate half (even rows)
    wl = jnp.transpose(w1[1::2, :])          # (H, I) linear half (odd rows)
    bg = b1[0::2]
    bl = b1[1::2]
    w2t = jnp.transpose(w2)                  # (I, H)
    if pad_I:
        # Zero padding is exact: padded gate cols give g=0 -> y=0, and the
        # matching zero rows of W2 contribute nothing.
        wg = jnp.pad(wg, ((0, 0), (0, pad_I)))
        wl = jnp.pad(wl, ((0, 0), (0, pad_I)))
        bg = jnp.pad(bg, (0, pad_I))
        bl = jnp.pad(bl, (0, pad_I))
        w2t = jnp.pad(w2t, ((0, pad_I), (0, 0)))

    nb = Ip // ti
    # Fused layout: per ti-block a contiguous (H, 2*ti) slab [gate_k | linear_k]
    # so the kernel issues a single (tm,H)@(H,2*ti) matmul per block.
    w1f = jnp.concatenate([wg.reshape(H, nb, ti), wl.reshape(H, nb, ti)],
                          axis=2).reshape(H, 2 * Ip)
    b1f = jnp.concatenate([bg.reshape(nb, ti), bl.reshape(nb, ti)],
                          axis=1).reshape(1, 2 * Ip)
    b2r = b2.reshape(1, H)

    return dict(w1f=w1f, b1f=b1f, w2t=w2t, b2r=b2r,
                H=H, I=I, Ip=Ip, ti=ti,
                target_tm=target_tm, vmem_cap=vmem_cap)


def _swiglu_mlp_kernel(x_ref, w1_ref, b1_ref, w2_ref, b2_ref, o_ref, acc_ref,
                       *, ti):
    k = pl.program_id(1)

    @pl.when(k == 0)
    def _():
        acc_ref[...] = jnp.zeros_like(acc_ref)

    x = x_ref[...]                                             # (tm, H)
    # One fused MXU pass: gate and linear projections together.
    gl = jnp.dot(x, w1_ref[...], preferred_element_type=jnp.float32) + b1_ref[...]
    g = gl[:, :ti]                                             # lane-aligned halves
    lin = gl[:, ti:]
    # swiglu: g * sigmoid(1.702 g) * (lin + 1); divide runs on the EUP slot.
    s = pl.reciprocal(1.0 + jnp.exp(-1.702 * g), approx=True)
    y = g * s * (lin + 1.0)                                    # (tm, ti) f32
    acc_ref[...] += jnp.dot(y.astype(w2_ref.dtype), w2_ref[...],
                            preferred_element_type=jnp.float32)

    @pl.when(k == pl.num_programs(1) - 1)
    def _():
        # b2 added exactly once, in the finalize of the I reduction.
        o_ref[...] = (acc_ref[...] + b2_ref[...]).astype(o_ref.dtype)


def swiglu_mlp(x, prepared):
    """x: (N, H) with leading batch/seq dims pre-flattened."""
    N, H = x.shape
    assert H == prepared["H"]
    Ip, ti = prepared["Ip"], prepared["ti"]
    target_tm, vmem_cap = prepared["target_tm"], prepared["vmem_cap"]
    w_itemsize = jnp.dtype(prepared["w1f"].dtype).itemsize
    x_itemsize = jnp.dtype(x.dtype).itemsize
    resident = (ti == Ip)
    vmem_budget = int(0.85 * vmem_cap)

    tm = max(8, min(_round_up(target_tm, 8), _round_up(N, 8)))
    # Shrink the token tile until the footprint fits physical VMEM (v7x: 64 MiB).
    while tm > 8 and _vmem_footprint(tm, ti, H, w_itemsize, x_itemsize,
                                     resident) > vmem_budget:
        tm = _round_up(tm // 2, 8)
    # Give both TensorCores work (megacore "parallel" axis) when there would
    # otherwise be a single token tile.
    if _cdiv(N, tm) < 2 and N > 8:
        tm = _round_up(_cdiv(N, 2), 8)

    Np = _round_up(N, tm)
    if Np != N:
        x = jnp.pad(x, ((0, Np - N), (0, 0)))

    grid = (Np // tm, Ip // ti)
    est = _vmem_footprint(tm, ti, H, w_itemsize, x_itemsize, resident)
    vmem_limit = int(min(0.90 * vmem_cap, max(32 * 2**20, 1.25 * est)))

    kernel = functools.partial(_swiglu_mlp_kernel, ti=ti)
    out = pl.pallas_call(
        kernel,
        out_shape=jax.ShapeDtypeStruct((Np, H), x.dtype),
        grid_spec=pltpu.PrefetchScalarGridSpec(
            num_scalar_prefetch=0,
            grid=grid,
            in_specs=[
                pl.BlockSpec((tm, H), lambda i, k: (i, 0)),        # x tile
                pl.BlockSpec((H, 2 * ti), lambda i, k: (0, k)),    # [Wg_k | Wl_k]
                pl.BlockSpec((1, 2 * ti), lambda i, k: (0, k)),    # [bg_k | bl_k]
                pl.BlockSpec((ti, H), lambda i, k: (k, 0)),        # W2_k
                pl.BlockSpec((1, H), lambda i, k: (0, 0)),         # b2
            ],
            out_specs=pl.BlockSpec((tm, H), lambda i, k: (i, 0)),
            scratch_shapes=[pltpu.VMEM((tm, H), jnp.float32)],
        ),
        compiler_params=pltpu.CompilerParams(
            dimension_semantics=("parallel", "arbitrary"),
            vmem_limit_bytes=vmem_limit,
        ),
    )(x, prepared["w1f"], prepared["b1f"], prepared["w2t"], prepared["b2r"])

    return out[:N] if Np != N else out


def swiglu_mlp_ref(x, w1, b1, w2, b2):
    """Pure-JAX reference mirroring the PyTorch module exactly."""
    x1 = x @ w1.T + b1                               # (N, 2I)
    dim = x1.shape[-1]
    xr = x1.reshape(-1, dim // 2, 2)
    x_glu, x_lin = xr[..., 0], xr[..., 1]
    y = x_glu * jax.nn.sigmoid(1.702 * x_glu) * (x_lin + 1.0)
    return y @ w2.T + b2


if __name__ == "__main__":
    key = jax.random.PRNGKey(0)
    batch, seq, hidden, inter = 2, 8, 32, 64
    N = batch * seq

    k_x, k_w1, k_b1, k_w2, k_b2 = jax.random.split(key, 5)
    x = jax.random.normal(k_x, (N, hidden), dtype=jnp.float32)
    # Shapes follow nn.Linear(hidden, 2*inter), nn.Linear(inter, hidden).
    w1 = jax.random.normal(k_w1, (2 * inter, hidden), dtype=jnp.float32) * 0.05
    b1 = jax.random.normal(k_b1, (2 * inter,), dtype=jnp.float32) * 0.05
    w2 = jax.random.normal(k_w2, (hidden, inter), dtype=jnp.float32) * 0.05
    b2 = jax.random.normal(k_b2, (hidden,), dtype=jnp.float32) * 0.05

    # One-time weight prep (hoisted out of the per-call hot path).
    prepared = prepare_swiglu_weights(w1, b1, w2, b2)

    out = jax.block_until_ready(swiglu_mlp(x, prepared))
    ref = swiglu_mlp_ref(x, w1, b1, w2, b2)
    assert out.shape == (N, hidden)
    assert jnp.allclose(out, ref, atol=1e-3, rtol=1e-3), "mismatch vs reference"

    # Ragged-N (token padding) path.
    x_odd = x[:13]
    out_odd = jax.block_until_ready(swiglu_mlp(x_odd, prepared))
    assert out_odd.shape == (13, hidden)
    assert jnp.allclose(out_odd, swiglu_mlp_ref(x_odd, w1, b1, w2, b2),
                        atol=1e-3, rtol=1e-3), "mismatch (ragged N)"

    # Streaming-I path (multi-step k reduction + intermediate-dim padding).
    inter2 = 192
    w1b = jax.random.normal(k_w1, (2 * inter2, hidden), dtype=jnp.float32) * 0.05
    b1b = jax.random.normal(k_b1, (2 * inter2,), dtype=jnp.float32) * 0.05
    w2b = jax.random.normal(k_w2, (hidden, inter2), dtype=jnp.float32) * 0.05
    prepared_b = prepare_swiglu_weights(w1b, b1b, w2b, b2, max_ti=128)
    out_b = jax.block_until_ready(swiglu_mlp(x, prepared_b))
    ref_b = swiglu_mlp_ref(x, w1b, b1b, w2b, b2)
    assert jnp.allclose(out_b, ref_b, atol=1e-3, rtol=1e-3), "mismatch (streamed I)"

    print("KERNEL_OK")
</pallas_src>

<mosaic_0001>
module attributes {stable_mosaic.version = 11 : i64} {
  func.func @_swiglu_mlp_kernel(%arg0: i32, %arg1: i32, %arg2: memref<8x32xf32, #tpu.memory_space<vmem>>, %arg3: memref<32x256xf32, #tpu.memory_space<vmem>>, %arg4: memref<1x256xf32, #tpu.memory_space<vmem>>, %arg5: memref<128x32xf32, #tpu.memory_space<vmem>>, %arg6: memref<1x32xf32, #tpu.memory_space<vmem>>, %arg7: memref<8x32xf32, #tpu.memory_space<vmem>>, %arg8: memref<8x32xf32, #tpu.memory_space<vmem>>) attributes {dimension_semantics = [#tpu.dimension_semantics<parallel>, #tpu.dimension_semantics<arbitrary>], iteration_bounds = array<i64: 2, 1>, scalar_prefetch = 0 : i64, scratch_operands = 1 : i64, tpu.core_type = #tpu.core_type<tc>, window_params = [{transform_indices = @transform_0, window_bounds = array<i64: 8, 32>}, {transform_indices = @transform_1, window_bounds = array<i64: 32, 256>}, {transform_indices = @transform_2, window_bounds = array<i64: 1, 256>}, {transform_indices = @transform_3, window_bounds = array<i64: 128, 32>}, {pipeline_mode = #tpu.pipeline_mode<synchronous>, transform_indices = @transform_4, window_bounds = array<i64: 1, 32>}, {transform_indices = @transform_5, window_bounds = array<i64: 8, 32>}]} {
    %c0_i32 = arith.constant 0 : i32
    %0 = arith.cmpi eq, %arg1, %c0_i32 : i32
    %1 = arith.extui %0 : i1 to i32
    %c0_i32_0 = arith.constant 0 : i32
    %2 = arith.cmpi ne, %1, %c0_i32_0 : i32
    scf.if %2 {
      %cst_18 = arith.constant 0.000000e+00 : f32
      %29 = vector.broadcast %cst_18 : f32 to vector<8x32xf32>
      %c0_19 = arith.constant 0 : index
      %c0_20 = arith.constant 0 : index
      %30 = vector.load %arg8[%c0_19, %c0_20] : memref<8x32xf32, #tpu.memory_space<vmem>>, vector<8x32xf32>
      tpu.vector_store %arg8[%c0_19, %c0_20], %29 {strides = array<i32>} : memref<8x32xf32, #tpu.memory_space<vmem>>, vector<8x32xf32>,
    } else {
    }
    %c0 = arith.constant 0 : index
    %c0_1 = arith.constant 0 : index
    %3 = vector.load %arg2[%c0, %c0_1] : memref<8x32xf32, #tpu.memory_space<vmem>>, vector<8x32xf32>
    %c0_2 = arith.constant 0 : index
    %c0_3 = arith.constant 0 : index
    %4 = vector.load %arg3[%c0_2, %c0_3] : memref<32x256xf32, #tpu.memory_space<vmem>>, vector<32x256xf32>
    %cst = arith.constant dense<0.000000e+00> : vector<8x256xf32>
    %5 = tpu.matmul %3, %4, %cst {dimension_numbers = #tpu.dot_dimension_numbers<[1], [0], [0], [1], [0, 0, 1, 1], [], []>} : vector<8x32xf32>, vector<32x256xf32>, vector<8x256xf32> -> vector<8x256xf32>
    %c0_4 = arith.constant 0 : index
    %c0_5 = arith.constant 0 : index
    %6 = vector.load %arg4[%c0_4, %c0_5] : memref<1x256xf32, #tpu.memory_space<vmem>>, vector<1x256xf32>
    %7 = vector.broadcast %6 : vector<1x256xf32> to vector<8x256xf32>
    %8 = arith.addf %5, %7 : vector<8x256xf32>
    %9 = vector.extract_strided_slice %8 {offsets = [0, 0], sizes = [8, 128], strides = [1, 1]} : vector<8x256xf32> to vector<8x128xf32>
    %10 = vector.extract_strided_slice %8 {offsets = [0, 128], sizes = [8, 128], strides = [1, 1]} : vector<8x256xf32> to vector<8x128xf32>
    %cst_6 = arith.constant -1.702000e+00 : f32
    %11 = vector.broadcast %cst_6 : f32 to vector<8x128xf32>
    %12 = arith.mulf %11, %9 : vector<8x128xf32>
    %13 = math.exp %12 : vector<8x128xf32>
    %cst_7 = arith.constant 1.000000e+00 : f32
    %14 = vector.broadcast %cst_7 : f32 to vector<8x128xf32>
    %15 = arith.addf %14, %13 : vector<8x128xf32>
    %16 = tpu.reciprocal %15 {approx = true} : vector<8x128xf32> -> vector<8x128xf32>
    %17 = arith.mulf %9, %16 : vector<8x128xf32>
    %cst_8 = arith.constant 1.000000e+00 : f32
    %18 = vector.broadcast %cst_8 : f32 to vector<8x128xf32>
    %19 = arith.addf %10, %18 : vector<8x128xf32>
    %20 = arith.mulf %17, %19 : vector<8x128xf32>
    %c0_9 = arith.constant 0 : index
    %c0_10 = arith.constant 0 : index
    %21 = vector.load %arg8[%c0_9, %c0_10] : memref<8x32xf32, #tpu.memory_space<vmem>>, vector<8x32xf32>
    %c0_11 = arith.constant 0 : index
    %c0_12 = arith.constant 0 : index
    %22 = vector.load %arg5[%c0_11, %c0_12] : memref<128x32xf32, #tpu.memory_space<vmem>>, vector<128x32xf32>
    %cst_13 = arith.constant dense<0.000000e+00> : vector<8x32xf32>
    %23 = tpu.matmul %20, %22, %cst_13 {dimension_numbers = #tpu.dot_dimension_numbers<[1], [0], [0], [1], [0, 0, 1, 1], [], []>} : vector<8x128xf32>, vector<128x32xf32>, vector<8x32xf32> -> vector<8x32xf32>
    %24 = arith.addf %21, %23 : vector<8x32xf32>
    %c0_14 = arith.constant 0 : index
    %c0_15 = arith.constant 0 : index
    %25 = vector.load %arg8[%c0_14, %c0_15] : memref<8x32xf32, #tpu.memory_space<vmem>>, vector<8x32xf32>
    tpu.vector_store %arg8[%c0_14, %c0_15], %24 {strides = array<i32>} : memref<8x32xf32, #tpu.memory_space<vmem>>, vector<8x32xf32>,
    %c0_i32_16 = arith.constant 0 : i32
    %26 = arith.cmpi eq, %arg1, %c0_i32_16 : i32
    %27 = arith.extui %26 : i1 to i32
    %c0_i32_17 = arith.constant 0 : i32
    %28 = arith.cmpi ne, %27, %c0_i32_17 : i32
    scf.if %28 {
      %c0_18 = arith.constant 0 : index
      %c0_19 = arith.constant 0 : index
      %29 = vector.load %arg8[%c0_18, %c0_19] : memref<8x32xf32, #tpu.memory_space<vmem>>, vector<8x32xf32>
      %c0_20 = arith.constant 0 : index
      %c0_21 = arith.constant 0 : index
      %30 = vector.load %arg6[%c0_20, %c0_21] : memref<1x32xf32, #tpu.memory_space<vmem>>, vector<1x32xf32>
      %31 = vector.broadcast %30 : vector<1x32xf32> to vector<8x32xf32>
      %32 = arith.addf %29, %31 : vector<8x32xf32>
      %c0_22 = arith.constant 0 : index
      %c0_23 = arith.constant 0 : index
      %33 = vector.load %arg7[%c0_22, %c0_23] : memref<8x32xf32, #tpu.memory_space<vmem>>, vector<8x32xf32>
      tpu.vector_store %arg7[%c0_22, %c0_23], %32 {strides = array<i32>} : memref<8x32xf32, #tpu.memory_space<vmem>>, vector<8x32xf32>,
    } else {
    }
    return
  }
  func.func @transform_0(%arg0: i32, %arg1: i32) -> (i32, i32) {
    %c0_i32 = arith.constant 0 : i32
    %c0_i32_0 = arith.constant 0 : i32
    return %arg0, %c0_i32 : i32, i32
  }
  func.func @transform_1(%arg0: i32, %arg1: i32) -> (i32, i32) {
    %c0_i32 = arith.constant 0 : i32
    %c0_i32_0 = arith.constant 0 : i32
    return %c0_i32, %arg1 : i32, i32
  }
  func.func @transform_2(%arg0: i32, %arg1: i32) -> (i32, i32) {
    %c0_i32 = arith.constant 0 : i32
    %c0_i32_0 = arith.constant 0 : i32
    return %c0_i32, %arg1 : i32, i32
  }
  func.func @transform_3(%arg0: i32, %arg1: i32) -> (i32, i32) {
    %c0_i32 = arith.constant 0 : i32
    %c0_i32_0 = arith.constant 0 : i32
    return %arg1, %c0_i32 : i32, i32
  }
  func.func @transform_4(%arg0: i32, %arg1: i32) -> (i32, i32) {
    %c0_i32 = arith.constant 0 : i32
    %c0_i32_0 = arith.constant 0 : i32
    %c0_i32_1 = arith.constant 0 : i32
    return %c0_i32, %c0_i32_0 : i32, i32
  }
  func.func @transform_5(%arg0: i32, %arg1: i32) -> (i32, i32) {
    %c0_i32 = arith.constant 0 : i32
    %c0_i32_0 = arith.constant 0 : i32
    return %arg0, %c0_i32 : i32, i32
  }
}

</mosaic_0001>

<bundles_post_ra>
// kernel: tpu_custom_call.1
= control target key start
LH: loop header
LB: loop body
LE: loop exit
PB: predicated region body
PF: predicated region fallthrough
CT: control target
= control target key end

     0   :  { %10 = vsyncpa [#allocation4], 0  ;;  %s1070_s0 = inlined_call_operand.vmem [shape: f32[16,32], index: 0, kind: input, shape index: {}]   ;;  %s1071_s1 = inlined_call_operand.vmem [shape: f32[32,256], index: 1, kind: input, shape index: {}]   ;;  %s1072_s2 = inlined_call_operand.vmem [shape: f32[1,256], index: 2, kind: input, shape index: {}]   ;;  %s1073_s3 = inlined_call_operand.vmem [shape: f32[128,32], index: 3, kind: input, shape index: {}]   ;;  %s1074_s4 = inlined_call_operand.vmem [shape: f32[1,32], index: 4, kind: input, shape index: {}]   ;;  %s1075_s5 = inlined_call_operand.hbm [shape: f32[16,32], index: 5, kind: output, shape index: {}]  }
   0x1   :  { %12 = vsyncpa [#allocation4 + $0x1], 0  ;;  %s870_s18 = smov 0   ;;  %s872_s19 = smov 0  }
   0x2   :  { %s874_s20 = smov 0   ;;  %s876_s21 = smov 0  }
   0x3   :  { %s878_s22 = smov 0   ;;  %s880_s23 = smov 0  }
   0x4 LB: > { %s630_s24 = sadd.s32 4294967295, %s835_s23   ;;  %s631_s25 = sadd.s32 4294967294, %s835_s23   ;;  %s835_s23 = sphi %s880_s23, %s18_s23   ;;  %s831_s22 = sphi %s878_s22, %s1082_s22   ;;  %s827_s21 = sphi %s876_s21, %s1081_s21   ;;  %s823_s20 = sphi %s874_s20, %s1080_s20   ;;  %s819_s19 = sphi %s872_s19, %s1079_s19   ;;  %s815_s18 = sphi %s870_s18, %s1078_s18  }
   0x5   : > { %s30_s26 = sadd.s32 1, %s831_s22  ;;  %s162_s27 = sadd.s32 1, %s823_s20 }
   0x6   : > { %p32_p0 = scmp.ge.s32.totalorder %s30_s26, 2  ;;  %p172_p1 = scmp.ne.s32.totalorder %s823_s20, %s819_s19 }
   0x7   : > { %p173_p2 = scmp.eq.s32.totalorder %s630_s24, 1  ;;  %p178_p3 = scmp.ne.s32.totalorder %s819_s19, %s815_s18 }
   0x8   : > { %s1084_s26 = smov (%p32_p0, %s30_s26), 0  ;;  %p179_p5 = scmp.eq.s32.totalorder %s631_s25, 1 }
   0x9   : > { %p910_p4 = por %p173_p2, %p172_p1  ;;  %s159_s29 = ssub.s32 %s831_s22, %s1084_s26 }
   0xa   : > { %p637_p6 = scmp.ge.s32.totalorder %s835_s23, 1  ;;  %p160_p7 = scmp.eq.s32.totalorder %s159_s29, 0 }
   0xb   : > { %p917_p8 = por %p179_p5, %p178_p3  ;;  %p233_p9 = scmp.lt.s32.totalorder %s835_s23, 3 }
   0xc   : > { %s923_s6 = scalar_select %p160_p7, %s823_s20, %s162_s27  }
   0xd   : > { %p234_p10 = pnand %p637_p6, %p233_p9 }
   0xe   : > { %p274_p11 = scmp.lt.s32.totalorder (!%p234_p10), %s827_s21, 1  ;;  %s643_s29 = sshll.u32 (!%p234_p10), %s827_s21, 7 }
   0xf   : > { %237 = sbr.rel (%p234_p10) target bundleno = 480 (0x1e0), region = 40  ;;  %s519_s11 = scalar_lea.hbm (!%p234_p10), %s1075_s5, %s643_s29 }
  0x10   : > { %s839_s14 = smov (!%p234_p10), [#allocation3]  }
  0x11   : > { %s763_s15 = sshll.u32 (!%p234_p10), %s839_s14, 4  ;;  %s764_s15 = int_to_ptr.vmem [resolvable:$false] %s763_s15 }
  0x14   : > { %v309_v0 = vld [vmem:[%s1071_s1 + $0x38] sm:$0xff]  ;;  %v308_v1 = vld [vmem:[%s1071_s1 + $0x30] sm:$0xff]  ;;  %v307_v2 = vld [vmem:[%s1071_s1 + $0x28] sm:$0xff]  ;;  %vm299_vm0 = vcmask 261120   ;;  %v837_v4 = vmov 0.0   ;;  %s275_s17 = scalar_select %p274_p11, %s827_s21, 1  ;;  %v312_v26 = vlaneseq }
  0x15   : > { %350 = vmatprep.subr.mxu0 %v309_v0  ;;  %v306_v3 = vld [vmem:[%s1071_s1 + $0x20] sm:$0xff]  ;;  %390 = vmatprep.mubr.f32.mxu0 %v837_v4  ;;  %300 = vst.msk [vmem:[#allocation2] sm:$0xff] %vm299_vm0, %v837_v4  ;;  %v305_v5 = vld [vmem:[%s1071_s1 + $0x18] sm:$0xff]  ;;  %v304_v6 = vld [vmem:[%s1071_s1 + $0x10] sm:$0xff]  ;;  %vm838_vm1 = vmmov 0   ;;  %s765_s21 = scalar_lea.vmem %s764_s15, 256 }
  0x16   : > { %351 = vmatpush1.msra.mxu0 %v308_v1  ;;  %663 = vmatprep.subr.mxu1 %v837_v4  ;;  %v303_v7 = vld [vmem:[%s1071_s1 + $0x8] sm:$0xff]  ;;  %s639_s7 = sshll.u32 %s275_s17, 3  ;;  %v302_v8 = vld [vmem:[%s1071_s1] sm:$0xff]  ;;  %v421_v10 = vld [vmem:[%s1073_s3 + $0x78] sm:$0xff]  ;;  %v313_v27 = vshrl.u32 %v312_v26, 7  ;;  %s271_s17 = sand.u32 1, %s819_s19  }
  0x17   : > { %352 = vmatprep.subr.mxu0 %v307_v2  ;;  %s277_s12 = scalar_lea.vmem %s1070_s0, %s639_s7  ;;  %664 = vmatpush3.msra.mxu1 %v421_v10  ;;  %v420_v11 = vld [vmem:[%s1073_s3 + $0x70] sm:$0xff]  ;;  %v419_v12 = vld [vmem:[%s1073_s3 + $0x68] sm:$0xff]  ;;  %v418_v13 = vld [vmem:[%s1073_s3 + $0x60] sm:$0xff]  ;;  %s638_s24 = sshll.u32 %s271_s17, 3 }
  0x18   : > { %353 = vmatpush1.msra.mxu0 %v306_v3  ;;  %v301_v9 = vld [vmem:[%s277_s12] sm:$0xff]  ;;  %665 = vmatprep.subr.mxu1 %v837_v4  ;;  %v417_v14 = vld [vmem:[%s1073_s3 + $0x58] sm:$0xff]  ;;  %v416_v15 = vld [vmem:[%s1073_s3 + $0x50] sm:$0xff]  ;;  %v314_v28 = vsub.s32 0, %v313_v27  ;;  %v318_v37 = vsub.s32 1, %v313_v27  ;;  %s273_s7 = scalar_lea.vmem [#allocation3], %s638_s24 }
  0x19   : > { %354 = vmatprep.subr.mxu0 %v305_v5  ;;  %666 = vmatpush3.msra.mxu1 %v420_v11  ;;  %v415_v16 = vld [vmem:[%s1073_s3 + $0x48] sm:$0xff]  ;;  %v414_v17 = vld [vmem:[%s1073_s3 + $0x40] sm:$0xff]  ;;  %v413_v18 = vld [vmem:[%s1073_s3 + $0x38] sm:$0xff]  ;;  %s521_s8 = sshll.u32 %s273_s7, 4  ;;  %s508_s12 = scalar_lea.sflag [#allocation4], %s271_s17  ;;  %s522_s8 = int_to_ptr.vmem [resolvable:$true] %s521_s8 }
  0x1a   : > { %355 = vmatpush1.msra.mxu0 %v304_v6  ;;  %667 = vmatprep.subr.mxu1 %v837_v4  ;;  %v412_v19 = vld [vmem:[%s1073_s3 + $0x30] sm:$0xff]  ;;  %v411_v20 = vld [vmem:[%s1073_s3 + $0x28] sm:$0xff]  ;;  %v410_v21 = vld [vmem:[%s1073_s3 + $0x20] sm:$0xff]  ;;  %s759_s13 = scalar_lea.vmem %s522_s8, 128  ;;  %p766_p1 = scmp.lt.s32.totalorder %s522_s8, %s764_s15 }
  0x1b   : > { %356 = vmatprep.subr.mxu0 %v303_v7  ;;  %668 = vmatpush3.msra.mxu1 %v419_v12  ;;  %v409_v22 = vld [vmem:[%s1073_s3 + $0x18] sm:$0xff]  ;;  %v408_v23 = vld [vmem:[%s1073_s3 + $0x10] sm:$0xff]  ;;  %v407_v24 = vld [vmem:[%s1073_s3 + $0x8] sm:$0xff]  ;;  %p760_p12 = scmp.ne.s32.totalorder %s522_s8, %s759_s13  ;;  %p767_p2 = scmp.lt.s32.totalorder %s765_s21, %s759_s13 }
  0x1c   : > { %357 = vmatpush1.msra.mxu0 %v302_v8  ;;  %669 = vmatprep.subr.mxu1 %v837_v4  ;;  %v406_v25 = vld [vmem:[%s1073_s3] sm:$0xff] }
  0x1d   : > { %640 = vmatmul.mubr.msk.f32.vlgmr.msra.gmra.mxu0 %vm299_vm0, %v301_v9  ;;  %670 = vmatpush3.msra.mxu1 %v418_v13  ;;  %v310_v29 = vld [vmem:[%s1072_s2] sm:$0x3]  ;;  %p761_p13 = pnand %p760_p12, %p910_p4  ;;  %p768_p3 = por %p767_p2, %p766_p1 }
  0x1e   : > { %671 = vmatprep.subr.mxu1 %v837_v4  ;;  %695 = vmatprep.mubr.msk.f32.mxu1 %vm838_vm1, %v837_v4  ;;  %v315_v30 = vrot.slane %v310_v29, %v314_v28  ;;  %v319_v38 = vrot.slane %v310_v29, %v318_v37  ;;  %v405_v45 = vld [vmem:[#allocation2] sm:$0xff] }
  0x1f   : > { %672 = vmatpush3.msra.mxu1 %v417_v14  ;;  %v641_v49 = vld [vmem:[%s1074_s4] ss:$0 sm:$0xff]  ;;  %p762_p0 = pneg %p761_p13 }
  0x20   : > { %673 = vmatprep.subr.mxu1 %v837_v4 }
  0x21   : > { %674 = vmatpush3.msra.mxu1 %v416_v15  ;;  %p769_p5 = pnand %p768_p3, %p762_p0 }
  0x22   : > { %675 = vmatprep.subr.mxu1 %v837_v4 }
  0x23   : > { %676 = vmatpush3.msra.mxu1 %v415_v16 }
  0x24   : > { %677 = vmatprep.subr.mxu1 %v837_v4 }
  0x25   : > { %678 = vmatpush3.msra.mxu1 %v414_v17 }
  0x26   : > { %679 = vmatprep.subr.mxu1 %v837_v4 }
  0x27   : > { %680 = vmatpush3.msra.mxu1 %v413_v18 }
  0x28   : > { %681 = vmatprep.subr.mxu1 %v837_v4 }
  0x29   : > { %682 = vmatpush3.msra.mxu1 %v412_v19 }
  0x2a   : > { %683 = vmatprep.subr.mxu1 %v837_v4 }
  0x2b   : > { %684 = vmatpush3.msra.mxu1 %v411_v20 }
  0x2c   : > { %685 = vmatprep.subr.mxu1 %v837_v4 }
  0x2d   : > { %686 = vmatpush3.msra.mxu1 %v410_v21 }
  0x2e   : > { %687 = vmatprep.subr.mxu1 %v837_v4 }
  0x2f   : > { %688 = vmatpush3.msra.mxu1 %v409_v22 }
  0x30   : > { %689 = vmatprep.subr.mxu1 %v837_v4 }
  0x31   : > { %690 = vmatpush3.msra.mxu1 %v408_v23 }
  0x32   : > { %691 = vmatprep.subr.mxu1 %v837_v4 }
  0x33   : > { %692 = vmatpush3.msra.mxu1 %v407_v24 }
  0x34   : > { %693 = vmatprep.subr.mxu1 %v837_v4 }
  0x35   : > { %694 = vmatpush3.msra.mxu1 %v406_v25 }
  0xdd   : > { %v392_v31 = vpop.f32.mrf.mxu0 }
  0xde   : > { %v393_v32 = vadd.f32 %v392_v31, %v315_v30 }
  0xdf   : > { %v394_v39 = vpop.f32.mrf.mxu0 }
  0xe0   : > { %v397_v33 = vmul.f32 -1.702, %v393_v32  ;;  %v395_v40 = vadd.f32 %v394_v39, %v319_v38 }
  0xe2   : > { %v398_v34 = vmul.f32 1.442695, %v397_v33  ;;  %v403_v43 = vadd.f32 1.0, %v395_v40 }
  0xe4   : > { %755 = vpow2.f32 %v398_v34 }
  0xf1   : > { %v756_v35 = vpop.eup %755 }
  0xf2   : > { %v400_v36 = vadd.f32 1.0, %v756_v35 }
  0xf4   : > { %757 = vrcp.f32 %v400_v36 }
 0x101   : > { %v758_v41 = vpop.eup %757 }
 0x102   : > { %v402_v42 = vmul.f32 %v758_v41, %v393_v32 }
 0x104   : > { %v404_v44 = vmul.f32 %v403_v43, %v402_v42 }
 0x106   : > { %696 = vmatmul.mubr.f32.vlgmr.msra.gmra.mxu1 %v404_v44 }
 0x1c6   : > { %v488_v46 = vpop.f32.mrf.mxu1 }
 0x1c7   : > { %v492_v47 = vadd.f32 %v488_v46, %v405_v45 }
 0x1c8   : > { %v697_v48 = vpop.f32.mrf.mxu1 }
 0x1c9   : > { %493 = vst.msk [vmem:[#allocation2] sm:$0xff] %vm299_vm0, %v492_v47 }
 0x1d0   : > { %v497_v50 = vld [vmem:[#allocation2] sm:$0xff] }
 0x1d1   : > { %v505_v51 = vadd.f32 %v641_v49, %v497_v50 }
 0x1d3   : > { %506 = vst.msk [vmem:[%s273_s7] sm:$0xff] %vm299_vm0, %v505_v51 }
 0x1d4   : > { %772 = shalt.err (!%p769_p5)
}
 0x1d5   : > { %s773_s16 = scalar_lea.hbm %s519_s11, 128  ;;  %s777_s25 = scalar_lea.hbm %s1075_s5, 256 }
 0x1d6   : > { %p774_p6 = scmp.ne.s32.totalorder %s519_s11, %s773_s16  ;;  %p778_p10 = scmp.lt.s32.totalorder %s519_s11, %s1075_s5 }
 0x1d7   : > { %p779_p11 = scmp.lt.s32.totalorder %s777_s25, %s773_s16 }
 0x1d8   : > { %p775_p7 = pnand %p774_p6, %p910_p4 }
 0x1d9   : > { %p780_p12 = por %p779_p11, %p778_p10 }
 0x1da   : > { %p776_p9 = pneg %p775_p7 }
 0x1dc   : > { %p781_p13 = pnand %p780_p12, %p776_p9 }
 0x1de   : > { %784 = shalt.err (!%p781_p13)
}
 0x1df   : > { %698 = dma.vmem_to_hbm [thread:$0]  (%p910_p4), %s522_s8, 128, %s519_s11, %s508_s12  }
 0x1e0 PF: > { %p704_p0 = scmp.ge.s32.totalorder %s835_s23, 2  ;;  %s533_s7 = sand.u32 1, %s815_s18  }
 0x1e1   : > { %s534_s9 = scalar_lea.sflag [#allocation4], %s533_s7 }
 0x1e2   : > { %p701_p1 = pnand %p704_p0, %p917_p8 }
 0x1e4   : > { %p702_p2 = pneg %p701_p1 }
 0x1e6   : > { %810 = dma.done.wait (%p702_p2), %s534_s9, 128  }
 0x1e7   : > { %812 = vsyncadd (%p702_p2), %s534_s9, 4294967168  ;;  %s18_s23 = sadd.s32 1, %s835_s23   ;;  %s1078_s18 = smov %s819_s19 }
 0x1e8   : > { %p15_p3 = scmp.ge.s32.totalorder %s18_s23, 4   ;;  %s1079_s19 = smov %s823_s20 }
 0x1e9   : > { %s1080_s20 = smov %s923_s6  ;;  %s1081_s21 = smov %s831_s22 }
 0x1ea   : > { %s1082_s22 = smov %s1084_s26  ;;  %17 = sbr.rel (!%p15_p3) target bundleno = 4 (0x4), region = 92 }
 0x1ef   :  { %539 = vsyncpa [#allocation4], 1 }
 0x1f0   :  { %541 = vsyncpa [#allocation4 + $0x1], 1 }

</bundles_post_ra>
